<compile_context>
chip_gen: v6e
topology: v6e:2x2x1
jax: 0.10.0
libtpu: 0.0.40
codegen_flags: <defaults>
</compile_context>

<pallas_src>
import jax
import jax.numpy as jnp
from jax import lax
from jax.experimental import pallas as pl
from jax.experimental.pallas import tpu as pltpu

# ---- synthetic model dimensions ------------------------------------------
N_BATCH = 2
C_IN = 4
H = 16
W = 16
C_OUT = 8
KH = KW = 3
NUM_CLASSES = 10
PATCH = KH * KW * C_IN          # 36
HW = H * W                      # 256
W_SHIFT = 4                     # log2(W):  q >> 4 == q // W
assert W == 1 << W_SHIFT

# Single zero-padded parameter slab (one DMA instead of four tiny ones).
# slab layout (f32):
#   [0:8,   0:36]  conv weight transposed to (C_OUT, PATCH)
#   [0:8,  36:37]  conv bias as a column
#   [0:8,  37:47]  fc weight (C_OUT, NUM_CLASSES)
#   [8:9,   0:10]  fc bias as a row
SLAB_ROWS = 16
SLAB_COLS = 128


def detector_kernel(x_ref, params_ref, out_ref, patches_ref):
    """One invocation processes the whole batch.

    x_ref       : (N*C_IN, H*W) f32   row = n*C_IN + ci, col = h*W + w
    params_ref  : (16, 128) f32       packed parameter slab (layout above)
    out_ref     : (N, NUM_CLASSES)    class logits == model(x)[0]
    patches_ref : (PATCH, N*H*W) f32  VMEM scratch: transposed im2col matrix
    """
    wc_t = params_ref[0:C_OUT, 0:PATCH]                           # (8, 36)
    bc = params_ref[0:C_OUT, PATCH:PATCH + 1]                     # (8, 1)
    wf = params_ref[0:C_OUT, PATCH + 1:PATCH + 1 + NUM_CLASSES]   # (8, 10)
    bf = params_ref[C_OUT:C_OUT + 1, 0:NUM_CLASSES]               # (1, 10)

    # In-kernel im2col (lane-dense):
    #   patches[t*C_IN + ci, n*HW + q] = x[n*C_IN + ci, q + s]  if tap
    #   (kh, kw) is in-bounds at q, else 0;  t = kh*KW + kw,
    #   s = (kh-1)*W + (kw-1),  q = h*W + w.
    # Destination columns whose shifted source would fall outside [0, HW)
    # are exactly padding positions of that tap, so they keep this zero init.
    patches_ref[...] = jnp.zeros_like(patches_ref)

    # (h, w) coordinates of every column q (built once; W is a power of two,
    # so only shift/and -- no integer division on the VPU).
    q_idx = lax.broadcasted_iota(jnp.int32, (C_IN, HW), 1)
    h_idx = q_idx >> W_SHIFT
    w_idx = q_idx & (W - 1)

    for kh in range(KH):
        for kw in range(KW):
            dh, dw = kh - 1, kw - 1
            t = kh * KW + kw
            s = dh * W + dw                        # column shift of this tap
            dst_lo, dst_hi = max(0, -s), HW - max(0, s)
            src_lo, src_hi = dst_lo + s, dst_hi + s

            conds = []
            if dh < 0:
                conds.append(h_idx[:, dst_lo:dst_hi] >= -dh)
            if dh > 0:
                conds.append(h_idx[:, dst_lo:dst_hi] < H - dh)
            if dw < 0:
                conds.append(w_idx[:, dst_lo:dst_hi] >= -dw)
            if dw > 0:
                conds.append(w_idx[:, dst_lo:dst_hi] < W - dw)
            mask = None
            for c in conds:
                mask = c if mask is None else jnp.logical_and(mask, c)

            for n in range(N_BATCH):
                src = x_ref[n * C_IN:(n + 1) * C_IN, src_lo:src_hi]
                if mask is not None:
                    src = jnp.where(mask, src, 0.0)
                patches_ref[t * C_IN:(t + 1) * C_IN,
                            n * HW + dst_lo:n * HW + dst_hi] = src

    # Whole conv as ONE MXU matmul in lane-dense orientation:
    #   (8, 36) @ (36, 512) -> (8, 512) == 4 full vregs.
    act = jnp.dot(wc_t, patches_ref[...],
                  precision=lax.Precision.HIGHEST,
                  preferred_element_type=jnp.float32)
    act = jnp.maximum(act + bc, 0.0)               # bias + ReLU on 4 vregs

    # Global average pool (lane reduce over each batch's HW columns) + FC
    # head (broadcast-mul + sublane reduce; tiny, no transposes needed).
    inv_hw = 1.0 / float(HW)
    for n in range(N_BATCH):
        pooled = jnp.sum(act[:, n * HW:(n + 1) * HW],
                         axis=1, keepdims=True) * inv_hw          # (8, 1)
        row = jnp.sum(pooled * wf, axis=0, keepdims=True) + bf    # (1, 10)
        out_ref[n:n + 1, :] = row


@jax.jit
def detector_wrapper_forward(x_nchw, w_conv, b_conv, w_fc, b_fc):
    """Equivalent of DetectorWrapper(model)(x): returns model(x)[0]."""
    n = x_nchw.shape[0]

    # NCHW -> (N*C_IN, H*W): pure row-major collapse, no data movement.
    x2d = x_nchw.astype(jnp.float32).reshape(n * C_IN, HW)

    # Pack all parameters into one zero-padded slab -> single input DMA.
    # (kh, kw, ci) row order of this reshape matches the patch-row order
    # built inside the kernel.
    wc_t = w_conv.astype(jnp.float32).reshape(PATCH, C_OUT).T      # (8, 36)
    slab = jnp.zeros((SLAB_ROWS, SLAB_COLS), jnp.float32)
    slab = slab.at[0:C_OUT, 0:PATCH].set(wc_t)
    slab = slab.at[0:C_OUT, PATCH].set(b_conv.astype(jnp.float32))
    slab = slab.at[0:C_OUT, PATCH + 1:PATCH + 1 + NUM_CLASSES].set(
        w_fc.astype(jnp.float32))
    slab = slab.at[C_OUT, 0:NUM_CLASSES].set(b_fc.astype(jnp.float32))

    return pl.pallas_call(
        detector_kernel,
        out_shape=jax.ShapeDtypeStruct((n, NUM_CLASSES), jnp.float32),
        # Single grid step: whole (tiny) problem in one invocation.  If the
        # batch / spatial size grows, split N*H*W over a leading "parallel"
        # axis so v7x's second TensorCore is used.
        grid=(1,),
        in_specs=[
            pl.BlockSpec((n * C_IN, HW), lambda i: (0, 0)),
            pl.BlockSpec((SLAB_ROWS, SLAB_COLS), lambda i: (0, 0)),
        ],
        out_specs=pl.BlockSpec((n, NUM_CLASSES), lambda i: (0, 0)),
        scratch_shapes=[pltpu.VMEM((PATCH, n * HW), jnp.float32)],
        compiler_params=pltpu.CompilerParams(
            dimension_semantics=("arbitrary",)),
    )(x2d, slab)


@jax.jit
def reference_forward(x_nchw, w_conv, b_conv, w_fc, b_fc):
    """Pure-JAX reference (same math) for the correctness check."""
    x_nhwc = jnp.transpose(x_nchw, (0, 2, 3, 1)).astype(jnp.float32)
    y = lax.conv_general_dilated(
        x_nhwc, w_conv.astype(jnp.float32),
        window_strides=(1, 1), padding="SAME",
        dimension_numbers=("NHWC", "HWIO", "NHWC"),
        precision=lax.Precision.HIGHEST)
    y = jnp.maximum(y + b_conv.reshape(1, 1, 1, C_OUT), 0.0)
    pooled = jnp.mean(y, axis=(1, 2))                              # (N, 8)
    return (jnp.dot(pooled, w_fc, precision=lax.Precision.HIGHEST)
            + b_fc.reshape(1, NUM_CLASSES))


if __name__ == "__main__":
    key = jax.random.PRNGKey(0)
    kx, kwc, kbc, kwf, kbf = jax.random.split(key, 5)

    # Deterministic synthetic parameters (no checkpoint load).
    x = jax.random.normal(kx, (N_BATCH, C_IN, H, W), dtype=jnp.float32)
    w_conv = jax.random.normal(kwc, (KH, KW, C_IN, C_OUT),
                               dtype=jnp.float32) * 0.1
    b_conv = jax.random.normal(kbc, (C_OUT,), dtype=jnp.float32) * 0.1
    w_fc = jax.random.normal(kwf, (C_OUT, NUM_CLASSES),
                             dtype=jnp.float32) * 0.1
    b_fc = jax.random.normal(kbf, (NUM_CLASSES,), dtype=jnp.float32) * 0.1

    logits = jax.block_until_ready(
        detector_wrapper_forward(x, w_conv, b_conv, w_fc, b_fc))

    ref = reference_forward(x, w_conv, b_conv, w_fc, b_fc)
    assert logits.shape == (N_BATCH, NUM_CLASSES)
    assert jnp.allclose(logits, ref, atol=1e-4, rtol=1e-4), (
        f"max abs err = {jnp.max(jnp.abs(logits - ref))}")

    print("KERNEL_OK")
</pallas_src>

<mosaic_0001>
module attributes {stable_mosaic.version = 11 : i64} {
  func.func @detector_kernel(%arg0: i32, %arg1: memref<8x256xf32, #tpu.memory_space<vmem>>, %arg2: memref<16x128xf32, #tpu.memory_space<vmem>>, %arg3: memref<2x10xf32, #tpu.memory_space<vmem>>, %arg4: memref<36x512xf32, #tpu.memory_space<vmem>>) attributes {dimension_semantics = [#tpu.dimension_semantics<arbitrary>], iteration_bounds = array<i64: 1>, scalar_prefetch = 0 : i64, scratch_operands = 1 : i64, tpu.core_type = #tpu.core_type<tc>, window_params = [{pipeline_mode = #tpu.pipeline_mode<synchronous>, transform_indices = @transform_0, window_bounds = array<i64: 8, 256>}, {pipeline_mode = #tpu.pipeline_mode<synchronous>, transform_indices = @transform_1, window_bounds = array<i64: 16, 128>}, {pipeline_mode = #tpu.pipeline_mode<synchronous>, transform_indices = @transform_2, window_bounds = array<i64: 2, 10>}]} {
    %c0 = arith.constant 0 : index
    %c0_0 = arith.constant 0 : index
    %0 = vector.load %arg2[%c0, %c0_0] : memref<16x128xf32, #tpu.memory_space<vmem>>, vector<8x36xf32>
    %c0_1 = arith.constant 0 : index
    %c36 = arith.constant 36 : index
    %1 = vector.load %arg2[%c0_1, %c36] : memref<16x128xf32, #tpu.memory_space<vmem>>, vector<8x1xf32>
    %c0_2 = arith.constant 0 : index
    %c37 = arith.constant 37 : index
    %2 = vector.load %arg2[%c0_2, %c37] : memref<16x128xf32, #tpu.memory_space<vmem>>, vector<8x10xf32>
    %c8 = arith.constant 8 : index
    %c0_3 = arith.constant 0 : index
    %3 = vector.load %arg2[%c8, %c0_3] : memref<16x128xf32, #tpu.memory_space<vmem>>, vector<1x10xf32>
    %cst = arith.constant 0.000000e+00 : f32
    %4 = vector.broadcast %cst : f32 to vector<36x512xf32>
    %c0_4 = arith.constant 0 : index
    %c0_5 = arith.constant 0 : index
    %5 = vector.load %arg4[%c0_4, %c0_5] : memref<36x512xf32, #tpu.memory_space<vmem>>, vector<36x512xf32>
    tpu.vector_store %arg4[%c0_4, %c0_5], %4 {strides = array<i32>} : memref<36x512xf32, #tpu.memory_space<vmem>>, vector<36x512xf32>,
    %6 = tpu.iota {dimensions = array<i32: 1>} : vector<4x256xi32>
    %c4_i32 = arith.constant 4 : i32
    %7 = vector.broadcast %c4_i32 : i32 to vector<4x256xi32>
    %8 = arith.shrsi %6, %7 : vector<4x256xi32>
    %c15_i32 = arith.constant 15 : i32
    %9 = vector.broadcast %c15_i32 : i32 to vector<4x256xi32>
    %10 = arith.andi %6, %9 : vector<4x256xi32>
    %11 = vector.extract_strided_slice %8 {offsets = [0, 17], sizes = [4, 239], strides = [1, 1]} : vector<4x256xi32> to vector<4x239xi32>
    %c1_i32 = arith.constant 1 : i32
    %12 = vector.broadcast %c1_i32 : i32 to vector<4x239xi32>
    %13 = arith.cmpi sge, %11, %12 : vector<4x239xi32>
    %14 = vector.extract_strided_slice %10 {offsets = [0, 17], sizes = [4, 239], strides = [1, 1]} : vector<4x256xi32> to vector<4x239xi32>
    %c1_i32_6 = arith.constant 1 : i32
    %15 = vector.broadcast %c1_i32_6 : i32 to vector<4x239xi32>
    %16 = arith.cmpi sge, %14, %15 : vector<4x239xi32>
    %17 = arith.andi %13, %16 : vector<4x239xi1>
    %c0_7 = arith.constant 0 : index
    %c0_8 = arith.constant 0 : index
    %18 = vector.load %arg1[%c0_7, %c0_8] : memref<8x256xf32, #tpu.memory_space<vmem>>, vector<4x239xf32>
    %cst_9 = arith.constant 0.000000e+00 : f32
    %19 = vector.broadcast %cst_9 : f32 to vector<4x239xf32>
    %20 = arith.select %17, %18, %19 : vector<4x239xi1>, vector<4x239xf32>
    %c0_10 = arith.constant 0 : index
    %c17 = arith.constant 17 : index
    %21 = vector.load %arg4[%c0_10, %c17] : memref<36x512xf32, #tpu.memory_space<vmem>>, vector<4x239xf32>
    tpu.vector_store %arg4[%c0_10, %c17], %20 {strides = array<i32>} : memref<36x512xf32, #tpu.memory_space<vmem>>, vector<4x239xf32>,
    %c4 = arith.constant 4 : index
    %c0_11 = arith.constant 0 : index
    %22 = vector.load %arg1[%c4, %c0_11] : memref<8x256xf32, #tpu.memory_space<vmem>>, vector<4x239xf32>
    %cst_12 = arith.constant 0.000000e+00 : f32
    %23 = vector.broadcast %cst_12 : f32 to vector<4x239xf32>
    %24 = arith.select %17, %22, %23 : vector<4x239xi1>, vector<4x239xf32>
    %c0_13 = arith.constant 0 : index
    %c273 = arith.constant 273 : index
    %25 = vector.load %arg4[%c0_13, %c273] : memref<36x512xf32, #tpu.memory_space<vmem>>, vector<4x239xf32>
    tpu.vector_store %arg4[%c0_13, %c273], %24 {strides = array<i32>} : memref<36x512xf32, #tpu.memory_space<vmem>>, vector<4x239xf32>,
    %26 = vector.extract_strided_slice %8 {offsets = [0, 16], sizes = [4, 240], strides = [1, 1]} : vector<4x256xi32> to vector<4x240xi32>
    %c1_i32_14 = arith.constant 1 : i32
    %27 = vector.broadcast %c1_i32_14 : i32 to vector<4x240xi32>
    %28 = arith.cmpi sge, %26, %27 : vector<4x240xi32>
    %c0_15 = arith.constant 0 : index
    %c0_16 = arith.constant 0 : index
    %29 = vector.load %arg1[%c0_15, %c0_16] : memref<8x256xf32, #tpu.memory_space<vmem>>, vector<4x240xf32>
    %cst_17 = arith.constant 0.000000e+00 : f32
    %30 = vector.broadcast %cst_17 : f32 to vector<4x240xf32>
    %31 = arith.select %28, %29, %30 : vector<4x240xi1>, vector<4x240xf32>
    %c4_18 = arith.constant 4 : index
    %c16 = arith.constant 16 : index
    %32 = vector.load %arg4[%c4_18, %c16] : memref<36x512xf32, #tpu.memory_space<vmem>>, vector<4x240xf32>
    tpu.vector_store %arg4[%c4_18, %c16], %31 {strides = array<i32>} : memref<36x512xf32, #tpu.memory_space<vmem>>, vector<4x240xf32>,
    %c4_19 = arith.constant 4 : index
    %c0_20 = arith.constant 0 : index
    %33 = vector.load %arg1[%c4_19, %c0_20] : memref<8x256xf32, #tpu.memory_space<vmem>>, vector<4x240xf32>
    %cst_21 = arith.constant 0.000000e+00 : f32
    %34 = vector.broadcast %cst_21 : f32 to vector<4x240xf32>
    %35 = arith.select %28, %33, %34 : vector<4x240xi1>, vector<4x240xf32>
    %c4_22 = arith.constant 4 : index
    %c272 = arith.constant 272 : index
    %36 = vector.load %arg4[%c4_22, %c272] : memref<36x512xf32, #tpu.memory_space<vmem>>, vector<4x240xf32>
    tpu.vector_store %arg4[%c4_22, %c272], %35 {strides = array<i32>} : memref<36x512xf32, #tpu.memory_space<vmem>>, vector<4x240xf32>,
    %37 = vector.extract_strided_slice %8 {offsets = [0, 15], sizes = [4, 241], strides = [1, 1]} : vector<4x256xi32> to vector<4x241xi32>
    %c1_i32_23 = arith.constant 1 : i32
    %38 = vector.broadcast %c1_i32_23 : i32 to vector<4x241xi32>
    %39 = arith.cmpi sge, %37, %38 : vector<4x241xi32>
    %40 = vector.extract_strided_slice %10 {offsets = [0, 15], sizes = [4, 241], strides = [1, 1]} : vector<4x256xi32> to vector<4x241xi32>
    %c15_i32_24 = arith.constant 15 : i32
    %41 = vector.broadcast %c15_i32_24 : i32 to vector<4x241xi32>
    %42 = arith.cmpi slt, %40, %41 : vector<4x241xi32>
    %43 = arith.andi %39, %42 : vector<4x241xi1>
    %c0_25 = arith.constant 0 : index
    %c0_26 = arith.constant 0 : index
    %44 = vector.load %arg1[%c0_25, %c0_26] : memref<8x256xf32, #tpu.memory_space<vmem>>, vector<4x241xf32>
    %cst_27 = arith.constant 0.000000e+00 : f32
    %45 = vector.broadcast %cst_27 : f32 to vector<4x241xf32>
    %46 = arith.select %43, %44, %45 : vector<4x241xi1>, vector<4x241xf32>
    %c8_28 = arith.constant 8 : index
    %c15 = arith.constant 15 : index
    %47 = vector.load %arg4[%c8_28, %c15] : memref<36x512xf32, #tpu.memory_space<vmem>>, vector<4x241xf32>
    tpu.vector_store %arg4[%c8_28, %c15], %46 {strides = array<i32>} : memref<36x512xf32, #tpu.memory_space<vmem>>, vector<4x241xf32>,
    %c4_29 = arith.constant 4 : index
    %c0_30 = arith.constant 0 : index
    %48 = vector.load %arg1[%c4_29, %c0_30] : memref<8x256xf32, #tpu.memory_space<vmem>>, vector<4x241xf32>
    %cst_31 = arith.constant 0.000000e+00 : f32
    %49 = vector.broadcast %cst_31 : f32 to vector<4x241xf32>
    %50 = arith.select %43, %48, %49 : vector<4x241xi1>, vector<4x241xf32>
    %c8_32 = arith.constant 8 : index
    %c271 = arith.constant 271 : index
    %51 = vector.load %arg4[%c8_32, %c271] : memref<36x512xf32, #tpu.memory_space<vmem>>, vector<4x241xf32>
    tpu.vector_store %arg4[%c8_32, %c271], %50 {strides = array<i32>} : memref<36x512xf32, #tpu.memory_space<vmem>>, vector<4x241xf32>,
    %52 = vector.extract_strided_slice %10 {offsets = [0, 1], sizes = [4, 255], strides = [1, 1]} : vector<4x256xi32> to vector<4x255xi32>
    %c1_i32_33 = arith.constant 1 : i32
    %53 = vector.broadcast %c1_i32_33 : i32 to vector<4x255xi32>
    %54 = arith.cmpi sge, %52, %53 : vector<4x255xi32>
    %c0_34 = arith.constant 0 : index
    %c0_35 = arith.constant 0 : index
    %55 = vector.load %arg1[%c0_34, %c0_35] : memref<8x256xf32, #tpu.memory_space<vmem>>, vector<4x255xf32>
    %cst_36 = arith.constant 0.000000e+00 : f32
    %56 = vector.broadcast %cst_36 : f32 to vector<4x255xf32>
    %57 = arith.select %54, %55, %56 : vector<4x255xi1>, vector<4x255xf32>
    %c12 = arith.constant 12 : index
    %c1 = arith.constant 1 : index
    %58 = vector.load %arg4[%c12, %c1] : memref<36x512xf32, #tpu.memory_space<vmem>>, vector<4x255xf32>
    tpu.vector_store %arg4[%c12, %c1], %57 {strides = array<i32>} : memref<36x512xf32, #tpu.memory_space<vmem>>, vector<4x255xf32>,
    %c4_37 = arith.constant 4 : index
    %c0_38 = arith.constant 0 : index
    %59 = vector.load %arg1[%c4_37, %c0_38] : memref<8x256xf32, #tpu.memory_space<vmem>>, vector<4x255xf32>
    %cst_39 = arith.constant 0.000000e+00 : f32
    %60 = vector.broadcast %cst_39 : f32 to vector<4x255xf32>
    %61 = arith.select %54, %59, %60 : vector<4x255xi1>, vector<4x255xf32>
    %c12_40 = arith.constant 12 : index
    %c257 = arith.constant 257 : index
    %62 = vector.load %arg4[%c12_40, %c257] : memref<36x512xf32, #tpu.memory_space<vmem>>, vector<4x255xf32>
    tpu.vector_store %arg4[%c12_40, %c257], %61 {strides = array<i32>} : memref<36x512xf32, #tpu.memory_space<vmem>>, vector<4x255xf32>,
    %c0_41 = arith.constant 0 : index
    %c0_42 = arith.constant 0 : index
    %63 = vector.load %arg1[%c0_41, %c0_42] : memref<8x256xf32, #tpu.memory_space<vmem>>, vector<4x256xf32>
    %c16_43 = arith.constant 16 : index
    %c0_44 = arith.constant 0 : index
    %64 = vector.load %arg4[%c16_43, %c0_44] : memref<36x512xf32, #tpu.memory_space<vmem>>, vector<4x256xf32>
    tpu.vector_store %arg4[%c16_43, %c0_44], %63 {strides = array<i32>} : memref<36x512xf32, #tpu.memory_space<vmem>>, vector<4x256xf32>,
    %c4_45 = arith.constant 4 : index
    %c0_46 = arith.constant 0 : index
    %65 = vector.load %arg1[%c4_45, %c0_46] : memref<8x256xf32, #tpu.memory_space<vmem>>, vector<4x256xf32>
    %c16_47 = arith.constant 16 : index
    %c256 = arith.constant 256 : index
    %66 = vector.load %arg4[%c16_47, %c256] : memref<36x512xf32, #tpu.memory_space<vmem>>, vector<4x256xf32>
    tpu.vector_store %arg4[%c16_47, %c256], %65 {strides = array<i32>} : memref<36x512xf32, #tpu.memory_space<vmem>>, vector<4x256xf32>,
    %67 = vector.extract_strided_slice %10 {offsets = [0, 0], sizes = [4, 255], strides = [1, 1]} : vector<4x256xi32> to vector<4x255xi32>
    %c15_i32_48 = arith.constant 15 : i32
    %68 = vector.broadcast %c15_i32_48 : i32 to vector<4x255xi32>
    %69 = arith.cmpi slt, %67, %68 : vector<4x255xi32>
    %c0_49 = arith.constant 0 : index
    %c1_50 = arith.constant 1 : index
    %70 = vector.load %arg1[%c0_49, %c1_50] : memref<8x256xf32, #tpu.memory_space<vmem>>, vector<4x255xf32>
    %cst_51 = arith.constant 0.000000e+00 : f32
    %71 = vector.broadcast %cst_51 : f32 to vector<4x255xf32>
    %72 = arith.select %69, %70, %71 : vector<4x255xi1>, vector<4x255xf32>
    %c20 = arith.constant 20 : index
    %c0_52 = arith.constant 0 : index
    %73 = vector.load %arg4[%c20, %c0_52] : memref<36x512xf32, #tpu.memory_space<vmem>>, vector<4x255xf32>
    tpu.vector_store %arg4[%c20, %c0_52], %72 {strides = array<i32>} : memref<36x512xf32, #tpu.memory_space<vmem>>, vector<4x255xf32>,
    %c4_53 = arith.constant 4 : index
    %c1_54 = arith.constant 1 : index
    %74 = vector.load %arg1[%c4_53, %c1_54] : memref<8x256xf32, #tpu.memory_space<vmem>>, vector<4x255xf32>
    %cst_55 = arith.constant 0.000000e+00 : f32
    %75 = vector.broadcast %cst_55 : f32 to vector<4x255xf32>
    %76 = arith.select %69, %74, %75 : vector<4x255xi1>, vector<4x255xf32>
    %c20_56 = arith.constant 20 : index
    %c256_57 = arith.constant 256 : index
    %77 = vector.load %arg4[%c20_56, %c256_57] : memref<36x512xf32, #tpu.memory_space<vmem>>, vector<4x255xf32>
    tpu.vector_store %arg4[%c20_56, %c256_57], %76 {strides = array<i32>} : memref<36x512xf32, #tpu.memory_space<vmem>>, vector<4x255xf32>,
    %78 = vector.extract_strided_slice %8 {offsets = [0, 0], sizes = [4, 241], strides = [1, 1]} : vector<4x256xi32> to vector<4x241xi32>
    %c15_i32_58 = arith.constant 15 : i32
    %79 = vector.broadcast %c15_i32_58 : i32 to vector<4x241xi32>
    %80 = arith.cmpi slt, %78, %79 : vector<4x241xi32>
    %81 = vector.extract_strided_slice %10 {offsets = [0, 0], sizes = [4, 241], strides = [1, 1]} : vector<4x256xi32> to vector<4x241xi32>
    %c1_i32_59 = arith.constant 1 : i32
    %82 = vector.broadcast %c1_i32_59 : i32 to vector<4x241xi32>
    %83 = arith.cmpi sge, %81, %82 : vector<4x241xi32>
    %84 = arith.andi %80, %83 : vector<4x241xi1>
    %c0_60 = arith.constant 0 : index
    %c15_61 = arith.constant 15 : index
    %85 = vector.load %arg1[%c0_60, %c15_61] : memref<8x256xf32, #tpu.memory_space<vmem>>, vector<4x241xf32>
    %cst_62 = arith.constant 0.000000e+00 : f32
    %86 = vector.broadcast %cst_62 : f32 to vector<4x241xf32>
    %87 = arith.select %84, %85, %86 : vector<4x241xi1>, vector<4x241xf32>
    %c24 = arith.constant 24 : index
    %c0_63 = arith.constant 0 : index
    %88 = vector.load %arg4[%c24, %c0_63] : memref<36x512xf32, #tpu.memory_space<vmem>>, vector<4x241xf32>
    tpu.vector_store %arg4[%c24, %c0_63], %87 {strides = array<i32>} : memref<36x512xf32, #tpu.memory_space<vmem>>, vector<4x241xf32>,
    %c4_64 = arith.constant 4 : index
    %c15_65 = arith.constant 15 : index
    %89 = vector.load %arg1[%c4_64, %c15_65] : memref<8x256xf32, #tpu.memory_space<vmem>>, vector<4x241xf32>
    %cst_66 = arith.constant 0.000000e+00 : f32
    %90 = vector.broadcast %cst_66 : f32 to vector<4x241xf32>
    %91 = arith.select %84, %89, %90 : vector<4x241xi1>, vector<4x241xf32>
    %c24_67 = arith.constant 24 : index
    %c256_68 = arith.constant 256 : index
    %92 = vector.load %arg4[%c24_67, %c256_68] : memref<36x512xf32, #tpu.memory_space<vmem>>, vector<4x241xf32>
    tpu.vector_store %arg4[%c24_67, %c256_68], %91 {strides = array<i32>} : memref<36x512xf32, #tpu.memory_space<vmem>>, vector<4x241xf32>,
    %93 = vector.extract_strided_slice %8 {offsets = [0, 0], sizes = [4, 240], strides = [1, 1]} : vector<4x256xi32> to vector<4x240xi32>
    %c15_i32_69 = arith.constant 15 : i32
    %94 = vector.broadcast %c15_i32_69 : i32 to vector<4x240xi32>
    %95 = arith.cmpi slt, %93, %94 : vector<4x240xi32>
    %c0_70 = arith.constant 0 : index
    %c16_71 = arith.constant 16 : index
    %96 = vector.load %arg1[%c0_70, %c16_71] : memref<8x256xf32, #tpu.memory_space<vmem>>, vector<4x240xf32>
    %cst_72 = arith.constant 0.000000e+00 : f32
    %97 = vector.broadcast %cst_72 : f32 to vector<4x240xf32>
    %98 = arith.select %95, %96, %97 : vector<4x240xi1>, vector<4x240xf32>
    %c28 = arith.constant 28 : index
    %c0_73 = arith.constant 0 : index
    %99 = vector.load %arg4[%c28, %c0_73] : memref<36x512xf32, #tpu.memory_space<vmem>>, vector<4x240xf32>
    tpu.vector_store %arg4[%c28, %c0_73], %98 {strides = array<i32>} : memref<36x512xf32, #tpu.memory_space<vmem>>, vector<4x240xf32>,
    %c4_74 = arith.constant 4 : index
    %c16_75 = arith.constant 16 : index
    %100 = vector.load %arg1[%c4_74, %c16_75] : memref<8x256xf32, #tpu.memory_space<vmem>>, vector<4x240xf32>
    %cst_76 = arith.constant 0.000000e+00 : f32
    %101 = vector.broadcast %cst_76 : f32 to vector<4x240xf32>
    %102 = arith.select %95, %100, %101 : vector<4x240xi1>, vector<4x240xf32>
    %c28_77 = arith.constant 28 : index
    %c256_78 = arith.constant 256 : index
    %103 = vector.load %arg4[%c28_77, %c256_78] : memref<36x512xf32, #tpu.memory_space<vmem>>, vector<4x240xf32>
    tpu.vector_store %arg4[%c28_77, %c256_78], %102 {strides = array<i32>} : memref<36x512xf32, #tpu.memory_space<vmem>>, vector<4x240xf32>,
    %104 = vector.extract_strided_slice %8 {offsets = [0, 0], sizes = [4, 239], strides = [1, 1]} : vector<4x256xi32> to vector<4x239xi32>
    %c15_i32_79 = arith.constant 15 : i32
    %105 = vector.broadcast %c15_i32_79 : i32 to vector<4x239xi32>
    %106 = arith.cmpi slt, %104, %105 : vector<4x239xi32>
    %107 = vector.extract_strided_slice %10 {offsets = [0, 0], sizes = [4, 239], strides = [1, 1]} : vector<4x256xi32> to vector<4x239xi32>
    %c15_i32_80 = arith.constant 15 : i32
    %108 = vector.broadcast %c15_i32_80 : i32 to vector<4x239xi32>
    %109 = arith.cmpi slt, %107, %108 : vector<4x239xi32>
    %110 = arith.andi %106, %109 : vector<4x239xi1>
    %c0_81 = arith.constant 0 : index
    %c17_82 = arith.constant 17 : index
    %111 = vector.load %arg1[%c0_81, %c17_82] : memref<8x256xf32, #tpu.memory_space<vmem>>, vector<4x239xf32>
    %cst_83 = arith.constant 0.000000e+00 : f32
    %112 = vector.broadcast %cst_83 : f32 to vector<4x239xf32>
    %113 = arith.select %110, %111, %112 : vector<4x239xi1>, vector<4x239xf32>
    %c32 = arith.constant 32 : index
    %c0_84 = arith.constant 0 : index
    %114 = vector.load %arg4[%c32, %c0_84] : memref<36x512xf32, #tpu.memory_space<vmem>>, vector<4x239xf32>
    tpu.vector_store %arg4[%c32, %c0_84], %113 {strides = array<i32>} : memref<36x512xf32, #tpu.memory_space<vmem>>, vector<4x239xf32>,
    %c4_85 = arith.constant 4 : index
    %c17_86 = arith.constant 17 : index
    %115 = vector.load %arg1[%c4_85, %c17_86] : memref<8x256xf32, #tpu.memory_space<vmem>>, vector<4x239xf32>
    %cst_87 = arith.constant 0.000000e+00 : f32
    %116 = vector.broadcast %cst_87 : f32 to vector<4x239xf32>
    %117 = arith.select %110, %115, %116 : vector<4x239xi1>, vector<4x239xf32>
    %c32_88 = arith.constant 32 : index
    %c256_89 = arith.constant 256 : index
    %118 = vector.load %arg4[%c32_88, %c256_89] : memref<36x512xf32, #tpu.memory_space<vmem>>, vector<4x239xf32>
    tpu.vector_store %arg4[%c32_88, %c256_89], %117 {strides = array<i32>} : memref<36x512xf32, #tpu.memory_space<vmem>>, vector<4x239xf32>,
    %c0_90 = arith.constant 0 : index
    %c0_91 = arith.constant 0 : index
    %119 = vector.load %arg4[%c0_90, %c0_91] : memref<36x512xf32, #tpu.memory_space<vmem>>, vector<36x512xf32>
    %cst_92 = arith.constant dense<0.000000e+00> : vector<8x512xf32>
    %120 = tpu.matmul %0, %119, %cst_92 {dimension_numbers = #tpu.dot_dimension_numbers<[1], [0], [0], [1], [0, 0, 1, 1], [], []>, precision = #tpu.contract_precision<fp32>} : vector<8x36xf32>, vector<36x512xf32>, vector<8x512xf32> -> vector<8x512xf32>
    %121 = vector.broadcast %1 : vector<8x1xf32> to vector<8x512xf32>
    %122 = arith.addf %120, %121 : vector<8x512xf32>
    %cst_93 = arith.constant 0.000000e+00 : f32
    %123 = vector.broadcast %cst_93 : f32 to vector<8x512xf32>
    %124 = arith.maximumf %122, %123 : vector<8x512xf32>
    %125 = vector.extract_strided_slice %124 {offsets = [0, 0], sizes = [8, 256], strides = [1, 1]} : vector<8x512xf32> to vector<8x256xf32>
    %cst_94 = arith.constant dense<0.000000e+00> : vector<8xf32>
    %126 = vector.multi_reduction <add>, %125, %cst_94 [1] : vector<8x256xf32> to vector<8xf32>
    %127 = vector.shape_cast %126 : vector<8xf32> to vector<8x1xf32>
    %cst_95 = arith.constant 3.906250e-03 : f32
    %128 = vector.broadcast %cst_95 : f32 to vector<8x1xf32>
    %129 = arith.mulf %127, %128 : vector<8x1xf32>
    %130 = vector.broadcast %129 : vector<8x1xf32> to vector<8x10xf32>
    %131 = arith.mulf %130, %2 : vector<8x10xf32>
    %cst_96 = arith.constant dense<0.000000e+00> : vector<10xf32>
    %132 = vector.multi_reduction <add>, %131, %cst_96 [0] : vector<8x10xf32> to vector<10xf32>
    %133 = vector.shape_cast %132 : vector<10xf32> to vector<1x10xf32>
    %134 = arith.addf %133, %3 : vector<1x10xf32>
    %c0_97 = arith.constant 0 : index
    %c0_98 = arith.constant 0 : index
    %135 = vector.load %arg3[%c0_97, %c0_98] : memref<2x10xf32, #tpu.memory_space<vmem>>, vector<1x10xf32>
    tpu.vector_store %arg3[%c0_97, %c0_98], %134 {strides = array<i32>} : memref<2x10xf32, #tpu.memory_space<vmem>>, vector<1x10xf32>,
    %136 = vector.extract_strided_slice %124 {offsets = [0, 256], sizes = [8, 256], strides = [1, 1]} : vector<8x512xf32> to vector<8x256xf32>
    %cst_99 = arith.constant dense<0.000000e+00> : vector<8xf32>
    %137 = vector.multi_reduction <add>, %136, %cst_99 [1] : vector<8x256xf32> to vector<8xf32>
    %138 = vector.shape_cast %137 : vector<8xf32> to vector<8x1xf32>
    %cst_100 = arith.constant 3.906250e-03 : f32
    %139 = vector.broadcast %cst_100 : f32 to vector<8x1xf32>
    %140 = arith.mulf %138, %139 : vector<8x1xf32>
    %141 = vector.broadcast %140 : vector<8x1xf32> to vector<8x10xf32>
    %142 = arith.mulf %141, %2 : vector<8x10xf32>
    %cst_101 = arith.constant dense<0.000000e+00> : vector<10xf32>
    %143 = vector.multi_reduction <add>, %142, %cst_101 [0] : vector<8x10xf32> to vector<10xf32>
    %144 = vector.shape_cast %143 : vector<10xf32> to vector<1x10xf32>
    %145 = arith.addf %144, %3 : vector<1x10xf32>
    %c1_102 = arith.constant 1 : index
    %c0_103 = arith.constant 0 : index
    %146 = vector.load %arg3[%c1_102, %c0_103] : memref<2x10xf32, #tpu.memory_space<vmem>>, vector<1x10xf32>
    tpu.vector_store %arg3[%c1_102, %c0_103], %145 {strides = array<i32>} : memref<2x10xf32, #tpu.memory_space<vmem>>, vector<1x10xf32>,
    return
  }
  func.func @transform_0(%arg0: i32) -> (i32, i32) {
    %c0_i32 = arith.constant 0 : i32
    %c0_i32_0 = arith.constant 0 : i32
    %c0_i32_1 = arith.constant 0 : i32
    return %c0_i32, %c0_i32_0 : i32, i32
  }
  func.func @transform_1(%arg0: i32) -> (i32, i32) {
    %c0_i32 = arith.constant 0 : i32
    %c0_i32_0 = arith.constant 0 : i32
    %c0_i32_1 = arith.constant 0 : i32
    return %c0_i32, %c0_i32_0 : i32, i32
  }
  func.func @transform_2(%arg0: i32) -> (i32, i32) {
    %c0_i32 = arith.constant 0 : i32
    %c0_i32_0 = arith.constant 0 : i32
    %c0_i32_1 = arith.constant 0 : i32
    return %c0_i32, %c0_i32_0 : i32, i32
  }
}

</mosaic_0001>

<bundles_post_ra>
// kernel: detector_wrapper_forward.1
= control target key start
LH: loop header
LB: loop body
LE: loop exit
PB: predicated region body
PF: predicated region fallthrough
CT: control target
= control target key end

     0   :  { %s1667_s13 = smov 111   ;;  %s1668_s14 = smov 112   ;;  %v1671_v10 = vmov 0.0   ;;  %s2435_s0 = inlined_call_operand.vmem [shape: f32[8,256], index: 0, kind: input, shape index: {}]   ;;  %s2436_s1 = inlined_call_operand.vmem [shape: f32[16,128], index: 1, kind: input, shape index: {}]   ;;  %s2437_s2 = inlined_call_operand.hbm [shape: f32[2,10], index: 2, kind: output, shape index: {}]  }
   0x1   :  { %v357_v0 = vld [vmem:[%s2435_s0] sm:$0xf]  ;;  %v358_v2 = vld [vmem:[%s2435_s0 + $0x8] sm:$0xf]  ;;  %s1669_s23 = smov 127   ;;  %s1670_s28 = smov 113   ;;  %506 = vmatprep.mubr.f32.mxu0 %v1671_v10  ;;  %632 = vmatprep.mubr.f32.mxu1 %v1671_v10 }
   0x2   :  { %v309_v1 = vld [vmem:[%s2435_s0] sm:$0xf]  ;;  %361 = vrot.lane.b32.xlu0 %v357_v0, %s1667_s13  ;;  %v310_v3 = vld [vmem:[%s2435_s0 + $0x8] sm:$0xf]  ;;  %30 = vst [vmem:[#allocation2 + $0x80] sm:$0xf] %v1671_v10 }
   0x3   :  { %313 = vrot.lane.b32.xlu1 %v309_v1, %s1668_s14  ;;  %v226_v4 = vld [vmem:[%s2435_s0 + $0x8] sm:$0xf]  ;;  %v225_v5 = vld [vmem:[%s2435_s0] sm:$0xf]  ;;  %31 = vst [vmem:[#allocation2 + $0x88] sm:$0xf] %v1671_v10 }
   0x4   :  { %v276_v6 = vld [vmem:[%s2435_s0 + $0x8] sm:$0xf]  ;;  %v275_v7 = vld [vmem:[%s2435_s0] sm:$0xf]  ;;  %14 = vst [vmem:[#allocation2] sm:$0xff] %v1671_v10  ;;  %15 = vst [vmem:[#allocation2 + $0x8] sm:$0xff] %v1671_v10 }
   0x5   :  { %v166_v8 = vld [vmem:[%s2435_s0 + $0x8] sm:$0xf]  ;;  %v165_v9 = vld [vmem:[%s2435_s0] sm:$0xf]  ;;  %16 = vst [vmem:[#allocation2 + $0x10] sm:$0xff] %v1671_v10  ;;  %17 = vst [vmem:[#allocation2 + $0x18] sm:$0xff] %v1671_v10 }
   0x6   :  { %363 = vrot.lane.b32.xlu0 %v358_v2, %s1667_s13  ;;  %18 = vst [vmem:[#allocation2 + $0x20] sm:$0xff] %v1671_v10  ;;  %19 = vst [vmem:[#allocation2 + $0x28] sm:$0xff] %v1671_v10  ;;  %v212_v11 = vld [vmem:[%s2435_s0 + $0x8] sm:$0xf]  ;;  %v211_v12 = vld [vmem:[%s2435_s0] sm:$0xf] }
   0x7   :  { %315 = vrot.lane.b32.xlu1 %v310_v3, %s1668_s14  ;;  %20 = vst [vmem:[#allocation2 + $0x30] sm:$0xff] %v1671_v10  ;;  %21 = vst [vmem:[#allocation2 + $0x38] sm:$0xff] %v1671_v10  ;;  %s1672_s9 = smov 1  }
   0x8   :  { %22 = vst [vmem:[#allocation2 + $0x40] sm:$0xff] %v1671_v10  ;;  %23 = vst [vmem:[#allocation2 + $0x48] sm:$0xff] %v1671_v10 }
   0x9   :  { %24 = vst [vmem:[#allocation2 + $0x50] sm:$0xff] %v1671_v10  ;;  %25 = vst [vmem:[#allocation2 + $0x58] sm:$0xff] %v1671_v10 }
   0xa   :  { %229 = vrot.lane.b32.xlu0 %v225_v5, %s1669_s23  ;;  %26 = vst [vmem:[#allocation2 + $0x60] sm:$0xff] %v1671_v10  ;;  %27 = vst [vmem:[#allocation2 + $0x68] sm:$0xff] %v1671_v10 }
   0xb   :  { %231 = vrot.lane.b32.xlu1 %v226_v4, %s1669_s23  ;;  %28 = vst [vmem:[#allocation2 + $0x70] sm:$0xff] %v1671_v10  ;;  %29 = vst [vmem:[#allocation2 + $0x78] sm:$0xff] %v1671_v10 }
   0xc   :  { %32 = vst [vmem:[#allocation2 + $0x90] sm:$0xf] %v1671_v10  ;;  %33 = vst [vmem:[#allocation2 + $0x98] sm:$0xf] %v1671_v10 }
   0xd   :  { %214 = vst [vmem:[#allocation2 + $0x48] sm:$0xf] %v212_v11  ;;  %213 = vst [vmem:[#allocation2 + $0x40] sm:$0xf] %v211_v12 }
   0xe   :  { %279 = vrot.lane.b32.xlu0 %v275_v7, %s1670_s28 }
   0xf   :  { %281 = vrot.lane.b32.xlu1 %v276_v6, %s1670_s28 }
  0x12   :  { %169 = vrot.lane.b32.xlu0 %v165_v9, %s1672_s9 }
  0x13   :  { %171 = vrot.lane.b32.xlu1 %v166_v8, %s1672_s9 }
  0x14   :  { %7 = vsyncpa [#allocation4], 0  ;;  %v82_v13 = vld [vmem:[%s2435_s0 + $0x8] sm:$0xf]  ;;  %v81_v14 = vld [vmem:[%s2435_s0] sm:$0xf]  ;;  %v34_v55 = vlaneseq }
  0x15   :  { %s1673_s16 = smov 16   ;;  %v132_v15 = vld [vmem:[%s2435_s0 + $0x8] sm:$0xf]  ;;  %v131_v16 = vld [vmem:[%s2435_s0] sm:$0xf]  ;;  %s1674_s21 = smov 15  }
  0x16   :  { %85 = vrot.lane.b32.xlu0 %v81_v14, %s1673_s16  ;;  %v48_v17 = vld [vmem:[%s2435_s0 + $0x8] sm:$0xf]  ;;  %v47_v18 = vld [vmem:[%s2435_s0] sm:$0xf]  ;;  %v375_v19 = vld [vmem:[%s2435_s0 + $0x8] sm:$0xf0] }
  0x17   :  { %87 = vrot.lane.b32.xlu1 %v82_v13, %s1673_s16  ;;  %v374_v20 = vld [vmem:[%s2435_s0] sm:$0xf0]  ;;  %v216_v21 = vld [vmem:[%s2435_s0 + $0x8] sm:$0xf0]  ;;  %s1675_s6 = smov 17   ;;  %v379_v22 = vrot.slane %v375_v19, 4 }
  0x18   :  { %v378_v23 = vrot.slane %v374_v20, 4  ;;  %v220_v24 = vrot.slane %v216_v21, 4  ;;  %v333_v25 = vld [vmem:[%s2435_s0 + $0x8] sm:$0xf0]  ;;  %v332_v26 = vld [vmem:[%s2435_s0] sm:$0xf0] }
  0x19   :  { %v215_v27 = vld [vmem:[%s2435_s0] sm:$0xf0]  ;;  %v337_v29 = vrot.slane %v333_v25, 4  ;;  %v336_v30 = vrot.slane %v332_v26, 4  ;;  %v249_v31 = vld [vmem:[%s2435_s0 + $0x8] sm:$0xf0] }
  0x1a   :  { %135 = vrot.lane.b32.xlu0 %v131_v16, %s1674_s21  ;;  %224 = vst [vmem:[#allocation2 + $0x58] sm:$0xf] %v220_v24  ;;  %v219_v28 = vrot.slane %v215_v27, 4  ;;  %v248_v32 = vld [vmem:[%s2435_s0] sm:$0xf0]  ;;  %v253_v33 = vrot.slane %v249_v31, 4 }
  0x1b   :  { %137 = vrot.lane.b32.xlu1 %v132_v15, %s1674_s21  ;;  %v252_v34 = vrot.slane %v248_v32, 4  ;;  %v293_v35 = vld [vmem:[%s2435_s0 + $0x8] sm:$0xf0]  ;;  %v292_v36 = vld [vmem:[%s2435_s0] sm:$0xf0]  ;;  %v1676_v57 = vmov 36  }
  0x1c   :  { %223 = vst [vmem:[#allocation2 + $0x50] sm:$0xf] %v219_v28  ;;  %v297_v37 = vrot.slane %v293_v35, 4  ;;  %v296_v38 = vrot.slane %v292_v36, 4  ;;  %v189_v39 = vld [vmem:[%s2435_s0 + $0x8] sm:$0xf0]  ;;  %1643 = vset.pattern.permute.xlu0 %v1676_v57 }
  0x1d   :  { %v188_v40 = vld [vmem:[%s2435_s0] sm:$0xf0]  ;;  %v193_v41 = vrot.slane %v189_v39, 4  ;;  %v105_v43 = vld [vmem:[%s2435_s0 + $0x8] sm:$0xf0]  ;;  %v1863_v58 = vand.u32 127, %v34_v55 }
  0x1e   :  { %51 = vrot.lane.b32.xlu0 %v47_v18, %s1675_s6  ;;  %v192_v42 = vrot.slane %v188_v40, 4  ;;  %v104_v44 = vld [vmem:[%s2435_s0] sm:$0xf0]  ;;  %v109_v45 = vrot.slane %v105_v43, 4  ;;  %v149_v47 = vld [vmem:[%s2435_s0 + $0x8] sm:$0xf0] }
  0x1f   :  { %53 = vrot.lane.b32.xlu1 %v48_v17, %s1675_s6  ;;  %v108_v46 = vrot.slane %v104_v44, 4  ;;  %v148_v48 = vld [vmem:[%s2435_s0] sm:$0xf0]  ;;  %v153_v49 = vrot.slane %v149_v47, 4  ;;  %v65_v51 = vld [vmem:[%s2435_s0 + $0x8] sm:$0xf0] }
  0x20   :  { %v152_v50 = vrot.slane %v148_v48, 4  ;;  %v64_v52 = vld [vmem:[%s2435_s0] sm:$0xf0]  ;;  %v69_v53 = vrot.slane %v65_v51, 4  ;;  %v1866_v59 = vadd.s32 128, %v1863_v58  ;;  %v37_v62 = vshra.s32 %v1863_v58, 4 }
  0x21   :  { %v68_v54 = vrot.slane %v64_v52, 4  ;;  %v1860_v56 = vld [vmem:[%s2436_s1] sm:$0xff]  ;;  %v39_v63 = vand.u32 15, %v1863_v58  ;;  %vm365_vm4 = vcmask 908288   ;;  %vm2439_vm6 = vcmask 916480   ;;  %s1678_s17 = smov 91  }
  0x22   :  { %380 = vrot.lane.b32.xlu0 %v378_v23, %s1667_s13  ;;  %v38_v60 = vshra.s32 %v1866_v59, 4  ;;  %v40_v61 = vand.u32 15, %v1866_v59  ;;  %vm1888_vm3 = vcmp.lt.s32.totalorder %v37_v62, 15  ;;  %vm372_vm7 = vcmask 904192   ;;  %s1679_s20 = smov [#allocation3]  }
  0x23   :  { %382 = vrot.lane.b32.xlu1 %v379_v22, %s1667_s13  ;;  %vm1882_vm2 = vcmp.lt.s32.totalorder %v39_v63, 15  ;;  %vm2438_vm9 = vcmask 916484   ;;  %vm2442_vm10 = vcmask 1039360   ;;  %vm1922_vm12 = vcmp.ge.s32.totalorder %v39_v63, 1  ;;  %s1622_s22 = sshll.u32 %s1679_s20, 4  ;;  %s1623_s22 = int_to_ptr.vmem [resolvable:$true] %s1622_s22 }
  0x24   :  { %vm1872_vm0 = vcmp.lt.s32.totalorder %v40_v61, 15  ;;  %vm1878_vm1 = vcmp.lt.s32.totalorder %v38_v60, 15  ;;  %vm2440_vm8 = vmand %vm1888_vm3, %vm1882_vm2  ;;  %vm1917_vm11 = vcmp.ge.s32.totalorder %v40_v61, 1  ;;  %vm2441_vm13 = vcmask 1039364   ;;  %p1650_p1 = scmp.lt.s32.totalorder %s1623_s22, %s1623_s22 }
  0x25   :  { %vm356_vm5 = vmand %vm1878_vm1, %vm1872_vm0  ;;  %vm2444_vm15 = vcmask 924672  }
  0x26   :  { %338 = vrot.lane.b32.xlu0 %v336_v30, %s1668_s14  ;;  %vm2445_vm14 = vmand %vm1878_vm1, %vm1917_vm11 }
  0x27   :  { %340 = vrot.lane.b32.xlu1 %v337_v29, %s1668_s14 }
  0x2a   :  { %254 = vrot.lane.b32.xlu0 %v252_v34, %s1669_s23 }
  0x2b   :  { %256 = vrot.lane.b32.xlu1 %v253_v33, %s1669_s23 }
  0x2e   :  { %298 = vrot.lane.b32.xlu0 %v296_v38, %s1670_s28 }
  0x2f   :  { %300 = vrot.lane.b32.xlu1 %v297_v37, %s1670_s28 }
  0x32   :  { %194 = vrot.lane.b32.xlu0 %v192_v42, %s1672_s9 }
  0x33   :  { %196 = vrot.lane.b32.xlu1 %v193_v41, %s1672_s9 }
  0x36   :  { %110 = vrot.lane.b32.xlu0 %v108_v46, %s1673_s16 }
  0x37   :  { %112 = vrot.lane.b32.xlu1 %v109_v45, %s1673_s16 }
  0x3a   :  { %154 = vrot.lane.b32.xlu0 %v152_v50, %s1674_s21 }
  0x3b   :  { %156 = vrot.lane.b32.xlu1 %v153_v49, %s1674_s21 }
  0x3e   :  { %70 = vrot.lane.b32.xlu0 %v68_v54, %s1675_s6 }
  0x3f   :  { %72 = vrot.lane.b32.xlu1 %v69_v53, %s1675_s6  ;;  %s1677_s6 = smov 37  }
  0x42   :  { %413 = vperm.xlu0 %1643, %v1860_v56  }
  0x74   :  { %v362_v2 = vpop.permute.xlu0 %361 }
  0x75   :  { %v314_v3 = vpop.permute.xlu1 %313 }
  0x78   :  { %v364_v6 = vpop.permute.xlu0 %363 }
  0x79   :  { %v316_v7 = vpop.permute.xlu1 %315  ;;  %v366_v8 = vsel %vm365_vm4, %v362_v2, %v364_v6  ;;  %v370_v9 = vsel %vm356_vm5, %v364_v6, 0.0 }
  0x7a   :  { %v318_v11 = vsel %vm2439_vm6, %v314_v3, %v316_v7  ;;  %v322_v12 = vsel %vm1878_vm1, %v316_v7, 0.0  ;;  %v369_v13 = vsel %vm2440_vm8, %v366_v8, 0.0  ;;  %373 = vst.msk [vmem:[#allocation2 + $0x88] sm:$0xf] %vm372_vm7, %v370_v9  ;;  %vm2448_vm6 = vmand %vm1888_vm3, %vm1922_vm12  ;;  %vm2446_vm8 = vcmask 1043456  }
  0x7b   :  { %v321_v14 = vsel %vm1888_vm3, %v318_v11, 0.0  ;;  %v326_v15 = vrot.slane %v322_v12, 4  ;;  %371 = vst [vmem:[#allocation2 + $0x80] sm:$0xf] %v369_v13 }
  0x7c   :  { %v325_v16 = vrot.slane %v321_v14, 4  ;;  %v230_v19 = vpop.permute.xlu0 %229 }
  0x7d   :  { %v232_v18 = vpop.permute.xlu1 %231  ;;  %331 = vst.msk [vmem:[#allocation2 + $0x68] sm:$0xf0] %vm2438_vm9, %v326_v15  ;;  %vm2443_vm9 = vcmask 920576  }
  0x7e   :  { %329 = vst [vmem:[#allocation2 + $0x60] sm:$0xf0] %v325_v16  ;;  %v238_v21 = vsel %vm1872_vm0, %v232_v18, 0.0  ;;  %v234_v22 = vsel %vm2442_vm10, %v230_v19, %v232_v18  ;;  %vm416_vm10 = vcmask 293888  }
  0x7f   :  { %v242_v23 = vrot.slane %v238_v21, 4  ;;  %v237_v24 = vsel %vm1882_vm2, %v234_v22, 0.0  ;;  %v1966_v42 = vsel %vm416_vm10, %v1860_v56, 0  ;;  %vm1982_vm10 = vcmp.ge.s32.totalorder %v38_v60, 1 }
  0x80   :  { %v241_v25 = vrot.slane %v237_v24, 4  ;;  %v280_v27 = vpop.permute.xlu0 %279  ;;  %v1992_v57 = vand.u32 4294901760, %v1966_v42 }
  0x81   :  { %247 = vst.msk [vmem:[#allocation2 + $0x48] sm:$0xf0] %vm2441_vm13, %v242_v23  ;;  %v282_v26 = vpop.permute.xlu1 %281  ;;  %v408_v30 = vld [vmem:[#allocation2 + $0x88] sm:$0xf]  ;;  %vm2447_vm13 = vcmask 7168  }
  0x82   :  { %245 = vst [vmem:[#allocation2 + $0x40] sm:$0xf0] %v241_v25  ;;  %v288_v28 = vsel %vm2445_vm14, %v282_v26, 0.0  ;;  %v284_v29 = vsel %vm2444_vm15, %v280_v27, %v282_v26  ;;  %v424_v32 = vsel %vm2446_vm8, %v408_v30, 0  ;;  %v407_v33 = vld [vmem:[#allocation2 + $0x80] sm:$0xf] }
  0x83   :  { %291 = vst.msk [vmem:[#allocation2 + $0x68] sm:$0xf] %vm2443_vm9, %v288_v28  ;;  %v287_v31 = vsel %vm2448_vm6, %v284_v29, 0.0  ;;  %v1953_v34 = vand.u32 4294901760, %v424_v32  ;;  %v421_v35 = vsel %vm2446_vm8, %v407_v33, 0  ;;  %vm2450_vm9 = vcmask 130048  }
  0x84   :  { %289 = vst [vmem:[#allocation2 + $0x60] sm:$0xf] %v287_v31  ;;  %v170_v37 = vpop.permute.xlu0 %169  ;;  %v1956_v38 = vand.u32 4294901760, %v421_v35  ;;  %vm2452_vm15 = vcmask 121856   ;;  %vm2449_vm14 = vcmask 1047564   ;;  %vm1973_vm8 = vcmp.ge.s32.totalorder %v37_v62, 1 }
  0x85   :  { %v172_v36 = vpop.permute.xlu1 %171  ;;  %v177_v40 = vsel %vm1922_vm12, %v170_v37, 0.0  ;;  %455 = vmatprep.subr.mxu0 %v1953_v34  ;;  %v1963_v41 = vsub.f32 %v424_v32, %v1953_v34  ;;  %vm2453_vm6 = vcmask 1047684   ;;  %v2062_v28 = vsub.f32 %v1966_v42, %v1992_v57 }
  0x86   :  { %v174_v39 = vsel %vm2447_vm13, %v170_v37, %v172_v36  ;;  %v181_v44 = vrot.slane %v177_v40, 4  ;;  %457 = vmatpush1.msra.mxu0 %v1956_v38  ;;  %v1978_v46 = vsub.f32 %v421_v35, %v1956_v38  ;;  %vm2454_vm13 = vcmask 1043576  }
  0x87   :  { %v178_v43 = vsel %vm1917_vm11, %v174_v39, 0.0  ;;  %v542_v49 = vand.u32 4294901760, %v1963_v41 }
  0x88   :  { %v182_v47 = vrot.slane %v178_v43, 4  ;;  %v400_v50 = vld [vmem:[#allocation2 + $0x48] sm:$0xff]  ;;  %v86_v52 = vpop.permute.xlu0 %85  ;;  %186 = vst.msk [vmem:[#allocation2 + $0x20] sm:$0xf0] %vm2449_vm14, %v181_v44  ;;  %v548_v54 = vand.u32 4294901760, %v1978_v46  ;;  %vm2451_vm14 = vmand %vm1973_vm8, %vm1882_vm2  ;;  %v2089_v43 = vand.u32 4294901760, %v2062_v28 }
  0x89   :  { %v88_v51 = vpop.permute.xlu1 %87  ;;  %v1988_v53 = vand.u32 4294901760, %v400_v50  ;;  %v399_v55 = vld [vmem:[#allocation2 + $0x40] sm:$0xff]  ;;  %v93_v59 = vsel %vm1973_vm8, %v86_v52, 0.0  ;;  %v543_v61 = vsub.f32 %v1963_v41, %v542_v49 }
  0x8a   :  { %187 = vst [vmem:[#allocation2 + $0x28] sm:$0xf0] %v182_v47  ;;  %v90_v58 = vsel %vm2450_vm9, %v86_v52, %v88_v51  ;;  %v404_v60 = vld [vmem:[#allocation2 + $0x68] sm:$0xff]  ;;  %v2000_v62 = vand.u32 4294901760, %v399_v55  ;;  %v97_v2 = vrot.slane %v93_v59, 4  ;;  %v549_v7 = vsub.f32 %v1978_v46, %v548_v54  ;;  %vm130_vm9 = vmand %vm1982_vm10, %vm1872_vm0 }
  0x8b   :  { %v94_v63 = vsel %vm1982_vm10, %v90_v58, 0.0  ;;  %v2008_v3 = vand.u32 4294901760, %v404_v60  ;;  %v403_v6 = vld [vmem:[#allocation2 + $0x60] sm:$0xff]  ;;  %v544_v11 = vand.u32 4294901760, %v543_v61  ;;  %v2020_v12 = vsub.f32 %v400_v50, %v1988_v53 }
  0x8c   :  { %v98_v8 = vrot.slane %v94_v63, 4  ;;  %v2017_v9 = vand.u32 4294901760, %v403_v6  ;;  %v136_v14 = vpop.permute.xlu0 %135  ;;  %v550_v15 = vand.u32 4294901760, %v549_v7  ;;  %102 = vst.msk [vmem:[#allocation2] sm:$0xf0] %vm2453_vm6, %v97_v2  ;;  %v2028_v18 = vsub.f32 %v399_v55, %v2000_v62 }
  0x8d   :  { %v138_v13 = vpop.permute.xlu1 %137  ;;  %459 = vmatprep.subr.mxu0 %v2008_v3  ;;  %v2025_v16 = vsub.f32 %v404_v60, %v2008_v3  ;;  %v143_v21 = vsel %vm2451_vm14, %v136_v14, 0.0  ;;  %545 = vmatprep.subr.mxu1 %v544_v11  ;;  %v566_v23 = vand.u32 4294901760, %v2020_v12  ;;  %vm55_vm14 = vcmask 138240  }
  0x8e   :  { %103 = vst [vmem:[#allocation2 + $0x8] sm:$0xf0] %v98_v8  ;;  %v140_v19 = vsel %vm2452_vm15, %v136_v14, %v138_v13  ;;  %461 = vmatpush1.msra.mxu0 %v2017_v9  ;;  %v2038_v22 = vsub.f32 %v403_v6, %v2017_v9  ;;  %146 = vst.msk [vmem:[#allocation2 + $0x20] sm:$0xf] %vm2454_vm13, %v143_v21  ;;  %551 = vmatpush1.msra.mxu1 %v550_v15  ;;  %v572_v26 = vand.u32 4294901760, %v2028_v18  ;;  %vm2455_vm6 = vcmask 1043592  }
  0x8f   :  { %v144_v24 = vsel %vm130_vm9, %v140_v19, 0.0  ;;  %463 = vmatprep.subr.mxu0 %v1988_v53  ;;  %vm45_vm15 = vmand %vm1973_vm8, %vm1922_vm12  ;;  %v554_v25 = vand.u32 4294901760, %v2025_v16  ;;  %v567_v32 = vsub.f32 %v2020_v12, %v566_v23  ;;  %v510_v2 = vsub.f32 %v2062_v28, %v2089_v43 }
  0x90   :  { %147 = vst [vmem:[#allocation2 + $0x28] sm:$0xf] %v144_v24  ;;  %465 = vmatpush1.msra.mxu0 %v2000_v62  ;;  %vm46_vm13 = vmand %vm1982_vm10, %vm1917_vm11  ;;  %v560_v27 = vand.u32 4294901760, %v2038_v22  ;;  %v52_v30 = vpop.permute.xlu0 %51  ;;  %v573_v37 = vsub.f32 %v2028_v18, %v572_v26 }
  0x91   :  { %v54_v29 = vpop.permute.xlu1 %53  ;;  %v555_v31 = vsub.f32 %v2025_v16, %v554_v25  ;;  %v59_v35 = vsel %vm45_vm15, %v52_v30, 0.0  ;;  %v568_v50 = vand.u32 4294901760, %v567_v32 }
  0x92   :  { %v56_v33 = vsel %vm55_vm14, %v52_v30, %v54_v29  ;;  %v561_v36 = vsub.f32 %v2038_v22, %v560_v27  ;;  %62 = vst.msk [vmem:[#allocation2] sm:$0xf] %vm2455_vm6, %v59_v35  ;;  %v574_v55 = vand.u32 4294901760, %v573_v37  ;;  %vm2472_vm6 = vmand %vm1888_vm3, %vm1882_vm2 }
  0x93   :  { %v60_v39 = vsel %vm46_vm13, %v56_v33, 0.0  ;;  %v556_v40 = vand.u32 4294901760, %v555_v31  ;;  %v2127_v33 = vand.u32 4294901760, %v510_v2 }
  0x94   :  { %63 = vst [vmem:[#allocation2 + $0x8] sm:$0xf] %v60_v39  ;;  %v562_v42 = vand.u32 4294901760, %v561_v36  ;;  %v381_v47 = vpop.permute.xlu0 %380 }
  0x95   :  { %v383_v44 = vpop.permute.xlu1 %382  ;;  %557 = vmatprep.subr.mxu1 %v556_v40  ;;  %v395_v58 = vld [vmem:[#allocation2 + $0x20] sm:$0xff] }
  0x96   :  { %v388_v51 = vsel %vm356_vm5, %v383_v44, 0.0  ;;  %v384_v52 = vsel %vm365_vm4, %v381_v47, %v383_v44  ;;  %563 = vmatpush1.msra.mxu1 %v562_v42  ;;  %v2103_v61 = vand.u32 4294901760, %v395_v58  ;;  %vm2473_vm4 = vcmask 916480  }
  0x97   :  { %390 = vst.msk [vmem:[#allocation2 + $0x98] sm:$0xf] %vm372_vm7, %v388_v51  ;;  %v387_v59 = vsel %vm2472_vm6, %v384_v52, 0.0  ;;  %569 = vmatprep.subr.mxu1 %v568_v50  ;;  %v396_v60 = vld [vmem:[#allocation2 + $0x28] sm:$0xff]  ;;  %vm2474_vm5 = vcmask 916484   ;;  %vm2475_vm6 = vcmask 1039360  }
  0x98   :  { %389 = vst [vmem:[#allocation2 + $0x90] sm:$0xf] %v387_v59  ;;  %575 = vmatpush1.msra.mxu1 %v574_v55  ;;  %v2105_v63 = vand.u32 4294901760, %v396_v60  ;;  %v339_v7 = vpop.permute.xlu0 %338  ;;  %v2110_v8 = vsub.f32 %v395_v58, %v2103_v61  ;;  %vm2476_vm7 = vcmask 1039364  }
  0x99   :  { %v341_v6 = vpop.permute.xlu1 %340  ;;  %v391_v14 = vld [vmem:[#allocation2] sm:$0xff] }
  0x9a   :  { %v346_v11 = vsel %vm1878_vm1, %v341_v6, 0.0  ;;  %v342_v13 = vsel %vm2473_vm4, %v339_v7, %v341_v6  ;;  %467 = vmatprep.subr.mxu0 %v2105_v63  ;;  %v2117_v15 = vsub.f32 %v396_v60, %v2105_v63  ;;  %v2122_v29 = vand.u32 4294901760, %v391_v14  ;;  %vm2477_vm4 = vmand %vm1878_vm1, %vm1917_vm11 }
  0x9b   :  { %v350_v19 = vrot.slane %v346_v11, 4  ;;  %v345_v21 = vsel %vm1888_vm3, %v342_v13, 0.0  ;;  %469 = vmatpush1.msra.mxu0 %v2103_v61  ;;  %v392_v24 = vld [vmem:[#allocation2 + $0x8] sm:$0xff]  ;;  %v584_v30 = vand.u32 4294901760, %v2110_v8  ;;  %vm2481_vm1 = vcmask 7168  }
  0x9c   :  { %v349_v31 = vrot.slane %v345_v21, 4  ;;  %v2125_v32 = vand.u32 4294901760, %v392_v24  ;;  %v578_v35 = vand.u32 4294901760, %v2117_v15  ;;  %v255_v37 = vpop.permute.xlu0 %254  ;;  %v2135_v40 = vsub.f32 %v391_v14, %v2122_v29 }
  0x9d   :  { %354 = vst.msk [vmem:[#allocation2 + $0x78] sm:$0xf0] %vm2474_vm5, %v350_v19  ;;  %v257_v36 = vpop.permute.xlu1 %256  ;;  %v585_v39 = vsub.f32 %v2110_v8, %v584_v30  ;;  %vm2478_vm5 = vcmask 924672  }
  0x9e   :  { %353 = vst [vmem:[#allocation2 + $0x70] sm:$0xf0] %v349_v31  ;;  %v262_v42 = vsel %vm1872_vm0, %v257_v36, 0.0  ;;  %v258_v44 = vsel %vm2475_vm6, %v255_v37, %v257_v36  ;;  %471 = vmatprep.subr.mxu0 %v2125_v32  ;;  %v579_v47 = vsub.f32 %v2117_v15, %v578_v35  ;;  %v2145_v50 = vsub.f32 %v392_v24, %v2125_v32 }
  0x9f   :  { %v266_v51 = vrot.slane %v262_v42, 4  ;;  %v261_v52 = vsel %vm1882_vm2, %v258_v44, 0.0  ;;  %473 = vmatpush1.msra.mxu0 %v2122_v29  ;;  %v596_v55 = vand.u32 4294901760, %v2135_v40  ;;  %v586_v7 = vand.u32 4294901760, %v585_v39 }
  0xa0   :  { %v265_v58 = vrot.slane %v261_v52, 4  ;;  %664 = vmatprep.subr.mxu0 %v1963_v41  ;;  %512 = vmatmul.mubr.f32.vlgmr.msra.gmra.mxu0 %v2127_v33  ;;  %v580_v59 = vand.u32 4294901760, %v579_v47  ;;  %v590_v60 = vand.u32 4294901760, %v2145_v50  ;;  %v299_v6 = vpop.permute.xlu0 %298  ;;  %vm2479_vm6 = vcmask 920576   ;;  %v410_v47 = vld [vmem:[#allocation2 + $0x98] sm:$0xf] }
  0xa1   :  { %270 = vst.msk [vmem:[#allocation2 + $0x58] sm:$0xf0] %vm2476_vm7, %v266_v51  ;;  %v301_v2 = vpop.permute.xlu1 %300  ;;  %667 = vmatpush1.msra.mxu0 %v1978_v46  ;;  %v597_v11 = vsub.f32 %v2135_v40, %v596_v55  ;;  %724 = vmatprep.mubr.f32.mxu0 %v1671_v10  ;;  %vm2480_vm7 = vmand %vm1888_vm3, %vm1922_vm12  ;;  %vm2482_vm3 = vcmask 1047564   ;;  %vm2490_vm0 = vcmask 1043592  }
  0xa2   :  { %269 = vst [vmem:[#allocation2 + $0x50] sm:$0xf0] %v265_v58  ;;  %v306_v13 = vsel %vm2477_vm4, %v301_v2, 0.0  ;;  %v302_v14 = vsel %vm2478_vm5, %v299_v6, %v301_v2  ;;  %581 = vmatprep.subr.mxu1 %v580_v59  ;;  %670 = vmatprep.subr.mxu0 %v2025_v16  ;;  %v591_v19 = vsub.f32 %v2145_v50, %v590_v60  ;;  %v409_v58 = vld [vmem:[#allocation2 + $0x90] sm:$0xf]  ;;  %vm2483_vm4 = vcmask 130048  }
  0xa3   :  { %308 = vst.msk [vmem:[#allocation2 + $0x78] sm:$0xf] %vm2479_vm6, %v306_v13  ;;  %v305_v1 = vsel %vm2480_vm7, %v302_v14, 0.0  ;;  %587 = vmatpush1.msra.mxu1 %v586_v7  ;;  %673 = vmatpush1.msra.mxu0 %v2038_v22  ;;  %v598_v36 = vand.u32 4294901760, %v597_v11  ;;  %vm2484_vm5 = vcmask 1043456   ;;  %vm2486_vm7 = vcmask 1047684  }
  0xa4   :  { %307 = vst [vmem:[#allocation2 + $0x70] sm:$0xf] %v305_v1  ;;  %676 = vmatprep.subr.mxu0 %v2020_v12  ;;  %v592_v21 = vand.u32 4294901760, %v591_v19  ;;  %v195_v31 = vpop.permute.xlu0 %194  ;;  %v430_v11 = vsel %vm2484_vm5, %v410_v47, 0  ;;  %vm2485_vm6 = vmmov %vm2484_vm5 }
  0xa5   :  { %v197_v24 = vpop.permute.xlu1 %196  ;;  %679 = vmatpush1.msra.mxu0 %v2028_v18  ;;  %v201_v5 = vsel %vm1922_vm12, %v195_v31, 0.0  ;;  %v427_v14 = vsel %vm2485_vm6, %v409_v58, 0 }
  0xa6   :  { %v198_v37 = vsel %vm2481_vm1, %v195_v31, %v197_v24  ;;  %593 = vmatprep.subr.mxu1 %v592_v21  ;;  %682 = vmatprep.subr.mxu0 %v2117_v15  ;;  %v205_v42 = vrot.slane %v201_v5, 4  ;;  %vm2487_vm1 = vcmask 121856   ;;  %v2230_v4 = vand.u32 4294901760, %v427_v14 }
  0xa7   :  { %v202_v39 = vsel %vm1917_vm11, %v198_v37, 0.0  ;;  %599 = vmatpush1.msra.mxu1 %v598_v36  ;;  %685 = vmatpush1.msra.mxu0 %v2110_v8 }
  0xa8   :  { %v206_v44 = vrot.slane %v202_v39, 4  ;;  %688 = vmatprep.subr.mxu0 %v2145_v50  ;;  %756 = vmatprep.subr.mxu1 %v1953_v34  ;;  %209 = vst.msk [vmem:[#allocation2 + $0x30] sm:$0xf0] %vm2482_vm3, %v205_v42  ;;  %v111_v52 = vpop.permute.xlu0 %110  ;;  %vm2488_vm3 = vmand %vm1973_vm8, %vm1882_vm2  ;;  %v402_v22 = vld [vmem:[#allocation2 + $0x58] sm:$0xff]  ;;  %v2265_v20 = vsub.f32 %v427_v14, %v2230_v4  ;;  %vm1579_vm2 = vcmask 384296  }
  0xa9   :  { %v113_v51 = vpop.permute.xlu1 %112  ;;  %634 = vmatmul.mubr.f32.vlgmr.msra.gmra.mxu1 %v1992_v57  ;;  %691 = vmatpush1.msra.mxu0 %v2135_v40  ;;  %v117_v2 = vsel %vm1973_vm8, %v111_v52, 0.0  ;;  %v401_v0 = vld [vmem:[#allocation2 + $0x50] sm:$0xff]  ;;  %vm1596_vm8 = vcmask 73728  }
  0xaa   :  { %210 = vst [vmem:[#allocation2 + $0x38] sm:$0xf0] %v206_v44  ;;  %v114_v59 = vsel %vm2483_vm4, %v111_v52, %v113_v51  ;;  %758 = vmatpush1.msra.mxu1 %v1956_v38  ;;  %842 = vmatprep.subr.mxu0 %v542_v49  ;;  %v121_v7 = vrot.slane %v117_v2, 4  ;;  %v406_v19 = vld [vmem:[#allocation2 + $0x78] sm:$0xff]  ;;  %vm2489_vm4 = vcmask 1043576   ;;  %v2267_v45 = vand.u32 4294901760, %v401_v0 }
  0xab   :  { %v118_v6 = vsel %vm1982_vm10, %v114_v59, 0.0  ;;  %760 = vmatprep.subr.mxu1 %v2008_v3  ;;  %727 = vmatmul.mubr.f32.vlgmr.msra.gmra.mxu0 %v2062_v28  ;;  %v405_v16 = vld [vmem:[#allocation2 + $0x70] sm:$0xff] }
  0xac   :  { %v122_v13 = vrot.slane %v118_v6, 4  ;;  %762 = vmatpush1.msra.mxu1 %v2017_v9  ;;  %846 = vmatpush1.msra.mxu0 %v548_v54  ;;  %125 = vst.msk [vmem:[#allocation2 + $0x10] sm:$0xf0] %vm2486_vm7, %v121_v7  ;;  %v155_v49 = vpop.permute.xlu0 %154  ;;  %v2219_v54 = vand.u32 4294901760, %v430_v11  ;;  %v2290_v40 = vsub.f32 %v401_v0, %v2267_v45 }
  0xad   :  { %764 = vmatprep.subr.mxu1 %v1988_v53  ;;  %850 = vmatprep.subr.mxu0 %v554_v25  ;;  %v157_v41 = vpop.permute.xlu1 %156  ;;  %v161_v46 = vsel %vm2488_vm3, %v155_v49, 0.0 }
  0xae   :  { %126 = vst [vmem:[#allocation2 + $0x18] sm:$0xf0] %v122_v13  ;;  %v158_v1 = vsel %vm2487_vm1, %v155_v49, %v157_v41  ;;  %766 = vmatpush1.msra.mxu1 %v2000_v62  ;;  %854 = vmatpush1.msra.mxu0 %v560_v27  ;;  %163 = vst.msk [vmem:[#allocation2 + $0x30] sm:$0xf] %vm2489_vm4, %v161_v46  ;;  %v2235_v27 = vand.u32 4294901760, %v406_v19  ;;  %v2253_v15 = vsub.f32 %v430_v11, %v2219_v54 }
  0xaf   :  { %v162_v25 = vsel %vm130_vm9, %v158_v1, 0.0  ;;  %768 = vmatprep.subr.mxu1 %v2105_v63  ;;  %858 = vmatprep.subr.mxu0 %v566_v23  ;;  %v2240_v23 = vand.u32 4294901760, %v405_v16  ;;  %v1141_v44 = vand.u32 4294901760, %v2290_v40 }
  0xb0   :  { %164 = vst [vmem:[#allocation2 + $0x38] sm:$0xf] %v162_v25  ;;  %770 = vmatpush1.msra.mxu1 %v2103_v61  ;;  %862 = vmatpush1.msra.mxu0 %v572_v26  ;;  %v71_v12 = vpop.permute.xlu0 %70  ;;  %v2250_v26 = vand.u32 4294901760, %v402_v22  ;;  %v2273_v17 = vsub.f32 %v406_v19, %v2235_v27 }
  0xb1   :  { %772 = vmatprep.subr.mxu1 %v2125_v32  ;;  %866 = vmatprep.subr.mxu0 %v578_v35  ;;  %v73_v21 = vpop.permute.xlu1 %72  ;;  %v77_v18 = vsel %vm45_vm15, %v71_v12, 0.0  ;;  %v2279_v48 = vsub.f32 %v405_v16, %v2240_v23 }
  0xb2   :  { %v74_v24 = vsel %vm55_vm14, %v71_v12, %v73_v21  ;;  %774 = vmatpush1.msra.mxu1 %v2122_v29  ;;  %807 = vmatprep.mubr.f32.mxu1 %v1671_v10  ;;  %79 = vst.msk [vmem:[#allocation2 + $0x10] sm:$0xf] %vm2490_vm0, %v77_v18  ;;  %v1123_v31 = vand.u32 4294901760, %v2273_v17 }
  0xb3   :  { %v78_v35 = vsel %vm46_vm13, %v74_v24, 0.0  ;;  %870 = vmatpush1.msra.mxu0 %v584_v30  ;;  %811 = vmatmul.mubr.f32.vlgmr.msra.gmra.mxu1 %v2089_v43  ;;  %v1111_v30 = vand.u32 4294901760, %v2253_v15  ;;  %v1129_v36 = vand.u32 4294901760, %v2279_v48 }
  0xb4   :  { %80 = vst [vmem:[#allocation2 + $0x18] sm:$0xf] %v78_v35  ;;  %874 = vmatprep.subr.mxu0 %v590_v60  ;;  %942 = vmatprep.subr.mxu1 %v1953_v34  ;;  %v2285_v34 = vsub.f32 %v402_v22, %v2250_v26 }
  0xb5   :  { %878 = vmatpush1.msra.mxu0 %v596_v55  ;;  %911 = vmatprep.mubr.f32.mxu0 %v1671_v10  ;;  %v397_v8 = vld [vmem:[#allocation2 + $0x30] sm:$0xff] }
  0xb6   :  { %944 = vmatpush1.msra.mxu1 %v1956_v38  ;;  %913 = vmatmul.mubr.f32.vlgmr.msra.gmra.mxu0 %v1992_v57  ;;  %v2292_v55 = vand.u32 4294901760, %v397_v8  ;;  %v1117_v38 = vand.u32 4294901760, %v2265_v20  ;;  %v1135_v5 = vand.u32 4294901760, %v2285_v34 }
  0xb7   :  { %946 = vmatprep.subr.mxu1 %v2008_v3  ;;  %1024 = vmatprep.subr.mxu0 %v2219_v54  ;;  %v398_v50 = vld [vmem:[#allocation2 + $0x38] sm:$0xff] }
  0xb8   :  { %948 = vmatpush1.msra.mxu1 %v2017_v9  ;;  %1026 = vmatpush1.msra.mxu0 %v2230_v4  ;;  %v2297_v60 = vand.u32 4294901760, %v398_v50  ;;  %v2303_v3 = vsub.f32 %v397_v8, %v2292_v55  ;;  %v1112_v9 = vsub.f32 %v2253_v15, %v1111_v30 }
  0xb9   :  { %950 = vmatprep.subr.mxu1 %v1988_v53  ;;  %1028 = vmatprep.subr.mxu0 %v2235_v27  ;;  %v393_v37 = vld [vmem:[#allocation2 + $0x10] sm:$0xff] }
  0xba   :  { %952 = vmatpush1.msra.mxu1 %v2000_v62  ;;  %1030 = vmatpush1.msra.mxu0 %v2240_v23  ;;  %v2313_v53 = vsub.f32 %v398_v50, %v2297_v60  ;;  %v1118_v62 = vsub.f32 %v2265_v20, %v1117_v38  ;;  %v2320_v42 = vand.u32 4294901760, %v393_v37  ;;  %v1153_v58 = vand.u32 4294901760, %v2303_v3 }
  0xbb   :  { %954 = vmatprep.subr.mxu1 %v2105_v63  ;;  %1032 = vmatprep.subr.mxu0 %v2250_v26  ;;  %v394_v39 = vld [vmem:[#allocation2 + $0x18] sm:$0xff]  ;;  %v1124_v63 = vsub.f32 %v2273_v17, %v1123_v31  ;;  %v1113_v59 = vand.u32 4294901760, %v1112_v9 }
  0xbc   :  { %956 = vmatpush1.msra.mxu1 %v2103_v61  ;;  %1034 = vmatpush1.msra.mxu0 %v2267_v45  ;;  %v2325_v47 = vand.u32 4294901760, %v394_v39  ;;  %v1147_v51 = vand.u32 4294901760, %v2313_v53  ;;  %v2334_v52 = vsub.f32 %v393_v37, %v2320_v42  ;;  %v1130_v61 = vsub.f32 %v2279_v48, %v1129_v36 }
  0xbd   :  { %958 = vmatprep.subr.mxu1 %v2125_v32  ;;  %1036 = vmatprep.subr.mxu0 %v2297_v60  ;;  %v1136_v32 = vsub.f32 %v2285_v34, %v1135_v5  ;;  %v1119_v7 = vand.u32 4294901760, %v1118_v62  ;;  %v1125_v13 = vand.u32 4294901760, %v1124_v63  ;;  %v1154_v49 = vsub.f32 %v2303_v3, %v1153_v58 }
  0xbe   :  { %960 = vmatpush1.msra.mxu1 %v2122_v29  ;;  %993 = vmatprep.mubr.f32.mxu1 %v1671_v10  ;;  %v1148_v2 = vsub.f32 %v2313_v53, %v1147_v51  ;;  %v2349_v6 = vsub.f32 %v394_v39, %v2325_v47  ;;  %v1142_v29 = vsub.f32 %v2290_v40, %v1141_v44  ;;  %v1165_v11 = vand.u32 4294901760, %v2334_v52 }
  0xbf   :  { %1038 = vmatpush1.msra.mxu0 %v2292_v55  ;;  %995 = vmatmul.mubr.f32.vlgmr.msra.gmra.mxu1 %v1992_v57  ;;  %v1131_v41 = vand.u32 4294901760, %v1130_v61  ;;  %v1137_v19 = vand.u32 4294901760, %v1136_v32  ;;  %v1155_v0 = vand.u32 4294901760, %v1154_v49 }
  0xc0   :  { %1114 = vmatprep.subr.mxu1 %v1113_v59  ;;  %1040 = vmatprep.subr.mxu0 %v2325_v47  ;;  %v1159_v14 = vand.u32 4294901760, %v2349_v6  ;;  %v1149_v1 = vand.u32 4294901760, %v1148_v2  ;;  %v1143_v16 = vand.u32 4294901760, %v1142_v29  ;;  %v1166_v25 = vsub.f32 %v2334_v52, %v1165_v11 }
  0xc1   :  { %1120 = vmatpush1.msra.mxu1 %v1119_v7  ;;  %1042 = vmatpush1.msra.mxu0 %v2320_v42 }
  0xc2   :  { %1126 = vmatprep.subr.mxu1 %v1125_v13  ;;  %1075 = vmatprep.mubr.f32.mxu0 %v1671_v10  ;;  %v1160_v46 = vsub.f32 %v2349_v6, %v1159_v14  ;;  %v1167_v21 = vand.u32 4294901760, %v1166_v25 }
  0xc3   :  { %1132 = vmatpush1.msra.mxu1 %v1131_v41  ;;  %1233 = vmatprep.subr.mxu0 %v2253_v15 }
  0xc4   :  { %1138 = vmatprep.subr.mxu1 %v1137_v19  ;;  %1081 = vmatmul.mubr.f32.vlgmr.msra.gmra.mxu0 %v2127_v33  ;;  %v1161_v22 = vand.u32 4294901760, %v1160_v46 }
  0xc5   :  { %1144 = vmatpush1.msra.mxu1 %v1143_v16  ;;  %1236 = vmatpush1.msra.mxu0 %v2265_v20 }
  0xc6   :  { %1150 = vmatprep.subr.mxu1 %v1149_v1  ;;  %1239 = vmatprep.subr.mxu0 %v2273_v17 }
  0xc7   :  { %1156 = vmatpush1.msra.mxu1 %v1155_v0  ;;  %1242 = vmatpush1.msra.mxu0 %v2279_v48 }
  0xc8   :  { %1245 = vmatprep.subr.mxu0 %v2285_v34  ;;  %1162 = vmatprep.subr.mxu1 %v1161_v22 }
  0xc9   :  { %1248 = vmatpush1.msra.mxu0 %v2290_v40  ;;  %1168 = vmatpush1.msra.mxu1 %v1167_v21 }
  0xca   :  { %1251 = vmatprep.subr.mxu0 %v2313_v53  ;;  %1201 = vmatprep.mubr.f32.mxu1 %v1671_v10  ;;  %v13_v53 = vld [vmem:[%s2436_s1 + $0x8] sm:$0x1] }
  0xcb   :  { %1254 = vmatpush1.msra.mxu0 %v2303_v3  ;;  %1203 = vmatmul.mubr.f32.vlgmr.msra.gmra.mxu1 %v1992_v57 }
  0xcc   :  { %1257 = vmatprep.subr.mxu0 %v2349_v6  ;;  %1325 = vmatprep.subr.mxu1 %v2219_v54 }
  0xcd   :  { %1260 = vmatpush1.msra.mxu0 %v2334_v52  ;;  %1293 = vmatprep.mubr.f32.mxu0 %v1671_v10 }
  0xce   :  { %1327 = vmatpush1.msra.mxu1 %v2230_v4  ;;  %1296 = vmatmul.mubr.f32.vlgmr.msra.gmra.mxu0 %v2062_v28 }
  0xcf   :  { %1329 = vmatprep.subr.mxu1 %v2235_v27  ;;  %1411 = vmatprep.subr.mxu0 %v1111_v30 }
  0xd0   :  { %1331 = vmatpush1.msra.mxu1 %v2240_v23  ;;  %1415 = vmatpush1.msra.mxu0 %v1117_v38 }
  0xd1   :  { %1333 = vmatprep.subr.mxu1 %v2250_v26  ;;  %1419 = vmatprep.subr.mxu0 %v1123_v31 }
  0xd2   :  { %1335 = vmatpush1.msra.mxu1 %v2267_v45  ;;  %1423 = vmatpush1.msra.mxu0 %v1129_v36 }
  0xd3   :  { %1337 = vmatprep.subr.mxu1 %v2297_v60  ;;  %1427 = vmatprep.subr.mxu0 %v1135_v5 }
  0xd4   :  { %1339 = vmatpush1.msra.mxu1 %v2292_v55  ;;  %1431 = vmatpush1.msra.mxu0 %v1141_v44 }
  0xd5   :  { %1341 = vmatprep.subr.mxu1 %v2325_v47  ;;  %1435 = vmatprep.subr.mxu0 %v1147_v51 }
  0xd6   :  { %1343 = vmatpush1.msra.mxu1 %v2320_v42  ;;  %1376 = vmatprep.mubr.f32.mxu1 %v1671_v10 }
  0xd7   :  { %1439 = vmatpush1.msra.mxu0 %v1153_v58  ;;  %1380 = vmatmul.mubr.f32.vlgmr.msra.gmra.mxu1 %v2089_v43  ;;  %v414_v43 = vpop.permute.xlu0 %413 }
  0xd8   :  { %1443 = vmatprep.subr.mxu0 %v1159_v14  ;;  %1511 = vmatprep.subr.mxu1 %v2219_v54 }
  0xd9   :  { %1447 = vmatpush1.msra.mxu0 %v1165_v11  ;;  %1480 = vmatprep.mubr.f32.mxu0 %v1671_v10 }
  0xda   :  { %1513 = vmatpush1.msra.mxu1 %v2230_v4  ;;  %1482 = vmatmul.mubr.f32.vlgmr.msra.gmra.mxu0 %v1992_v57 }
  0xdb   :  { %1515 = vmatprep.subr.mxu1 %v2235_v27  ;;  %1562 = vmatprep.mubr.f32.mxu1 %v1671_v10 }
  0xdc   :  { %1517 = vmatpush1.msra.mxu1 %v2240_v23 }
  0xdd   :  { %1519 = vmatprep.subr.mxu1 %v2250_v26 }
  0xde   :  { %1521 = vmatpush1.msra.mxu1 %v2267_v45 }
  0xdf   :  { %1523 = vmatprep.subr.mxu1 %v2297_v60 }
  0xe0   :  { %1525 = vmatpush1.msra.mxu1 %v2292_v55 }
  0xe1   :  { %1527 = vmatprep.subr.mxu1 %v2325_v47 }
  0xe2   :  { %1529 = vmatpush1.msra.mxu1 %v2320_v42 }
  0xe3   :  { %1564 = vmatmul.mubr.f32.vlgmr.msra.gmra.mxu1 %v1992_v57 }
 0x160   :  { %v513_v28 = vpop.f32.mrf.mxu0 }
 0x161   :  { %v514_v54 = vadd.f32 %v513_v28, %v414_v43 }
 0x162   :  { %v515_v33 = vpop.f32.mrf.mxu0 }
 0x163   :  { %v516_v4 = vadd.f32 %v515_v33, %v414_v43 }
 0x169   :  { %v635_v10 = vpop.f32.mrf.mxu1 }
 0x16a   :  { %v636_v23 = vadd.f32 %v635_v10, %v514_v54 }
 0x16b   :  { %v637_v27 = vpop.f32.mrf.mxu1  ;;  %v728_v12 = vpop.f32.mrf.mxu0 }
 0x16c   :  { %v638_v18 = vadd.f32 %v637_v27, %v516_v4  ;;  %v729_v15 = vadd.f32 %v728_v12, %v636_v23  ;;  %v1644_v12 = vld [vmem:[%s2436_s1] sm:$0xff]  ;;  %s1645_s1 = scalar_lea.vmem %s1623_s22, 32 }
 0x16d   :  { %v730_v26 = vpop.f32.mrf.mxu0  ;;  %p1646_p0 = scmp.ne.s32.totalorder %s1623_s22, %s1645_s1  ;;  %p1651_p2 = scmp.lt.s32.totalorder %s1645_s1, %s1645_s1 }
 0x16e   :  { %v731_v45 = vadd.f32 %v730_v26, %v638_v18 }
 0x16f   :  { %p1652_p3 = por %p1651_p2, %p1650_p1 }
 0x171   :  { %p1653_p4 = pnand %p1652_p3, %p1646_p0 }
 0x173   :  { %v812_v24 = vpop.f32.mrf.mxu1 }
 0x174   :  { %v813_v17 = vadd.f32 %v812_v24, %v729_v15 }
 0x175   :  { %v814_v35 = vpop.f32.mrf.mxu1 }
 0x176   :  { %v914_v20 = vpop.f32.mrf.mxu0  ;;  %v815_v48 = vadd.f32 %v814_v35, %v731_v45 }
 0x177   :  { %v915_v57 = vadd.f32 %v914_v20, %v813_v17 }
 0x178   :  { %v916_v8 = vpop.f32.mrf.mxu0 }
 0x179   :  { %v917_v34 = vadd.f32 %v916_v8, %v815_v48 }
 0x17f   :  { %v996_v30 = vpop.f32.mrf.mxu1 }
 0x180   :  { %v997_v40 = vadd.f32 %v996_v30, %v915_v57 }
 0x181   :  { %v998_v50 = vpop.f32.mrf.mxu1 }
 0x182   :  { %v999_v55 = vadd.f32 %v998_v50, %v917_v34  ;;  %v1570_v38 = vmax.f32 %v997_v40, 0.0 }
 0x184   :  { %v1571_v60 = vmax.f32 %v999_v55, 0.0  ;;  %v1082_v3 = vpop.f32.mrf.mxu0 }
 0x185   :  { %v1083_v37 = vadd.f32 %v1082_v3, %v414_v43 }
 0x186   :  { %v1574_v31 = vadd.f32 %v1571_v60, %v1570_v38  ;;  %v1084_v36 = vpop.f32.mrf.mxu0 }
 0x187   :  { %v1085_v5 = vadd.f32 %v1084_v36, %v414_v43 }
 0x188   :  { %1575 = vadd.xlane.f32.xlu1 %v1574_v31 }
 0x18b   :  { %v1204_v9 = vpop.f32.mrf.mxu1 }
 0x18c   :  { %v1205_v42 = vadd.f32 %v1204_v9, %v1083_v37 }
 0x18d   :  { %v1206_v62 = vpop.f32.mrf.mxu1 }
 0x18e   :  { %v1297_v39 = vpop.f32.mrf.mxu0  ;;  %v1207_v47 = vadd.f32 %v1206_v62, %v1085_v5 }
 0x18f   :  { %v1298_v51 = vadd.f32 %v1297_v39, %v1205_v42 }
 0x190   :  { %v1299_v63 = vpop.f32.mrf.mxu0 }
 0x191   :  { %v1300_v58 = vadd.f32 %v1299_v63, %v1207_v47 }
 0x197   :  { %v1381_v44 = vpop.f32.mrf.mxu1 }
 0x198   :  { %v1382_v59 = vadd.f32 %v1381_v44, %v1298_v51 }
 0x199   :  { %1588 = vrot.lane.b32.xlu1 %v13_v53, %s1677_s6  ;;  %v1383_v52 = vpop.f32.mrf.mxu1 }
 0x19a   :  { %v1483_v61 = vpop.f32.mrf.mxu0  ;;  %v1384_v32 = vadd.f32 %v1383_v52, %v1300_v58 }
 0x19b   :  { %v1484_v6 = vadd.f32 %v1483_v61, %v1382_v59 }
 0x19c   :  { %v1485_v2 = vpop.f32.mrf.mxu0 }
 0x19d   :  { %v1486_v29 = vadd.f32 %v1485_v2, %v1384_v32 }
 0x1a3   :  { %v1565_v7 = vpop.f32.mrf.mxu1 }
 0x1a4   :  { %v1566_v11 = vadd.f32 %v1565_v7, %v1484_v6 }
 0x1a5   :  { %v1567_v13 = vpop.f32.mrf.mxu1 }
 0x1a6   :  { %v1568_v14 = vadd.f32 %v1567_v13, %v1486_v29  ;;  %v1572_v41 = vmax.f32 %v1566_v11, 0.0 }
 0x1a8   :  { %v1573_v49 = vmax.f32 %v1568_v14, 0.0 }
 0x1aa   :  { %v1598_v19 = vadd.f32 %v1573_v49, %v1572_v41 }
 0x1ac   :  { %1599 = vadd.xlane.f32.xlu0 %v1598_v19 }
 0x211   :  { %v1576_v1 = vpop.xlane.xlu1 %1575 }
 0x212   :  { %v1577_v46 = vmul.f32 0.00390625, %v1576_v1 }
 0x214   :  { %v1578_v16 = vmul.f32 %v1577_v46, %v1860_v56 }
 0x215   :  { %v1589_v33 = vpop.permute.xlu1 %1588 }
 0x216   :  { %v1580_v25 = vsel %vm1579_vm2, %v1578_v16, 0.0 }
 0x217   :  { %v1581_v22 = vrot.slane %v1580_v25, 4 }
 0x219   :  { %v1582_v0 = vadd.f32 %v1581_v22, %v1580_v25 }
 0x21b   :  { %v1583_v21 = vrot.slane %v1582_v0, 2 }
 0x21d   :  { %v1584_v28 = vadd.f32 %v1583_v21, %v1582_v0 }
 0x21f   :  { %v1585_v43 = vrot.slane %v1584_v28, 1 }
 0x221   :  { %v1586_v10 = vadd.f32 %v1585_v43, %v1584_v28 }
 0x223   :  { %v1591_v54 = vadd.f32 %v1589_v33, %v1586_v10 }
 0x225   :  { %1593 = vrot.lane.b32.xlu0 %v1591_v54, %s1678_s17 }
 0x235   :  { %v1600_v4 = vpop.xlane.xlu0 %1599 }
 0x236   :  { %v1601_v27 = vmul.f32 0.00390625, %v1600_v4 }
 0x238   :  { %v1602_v23 = vmul.f32 %v1644_v12, %v1601_v27 }
 0x23a   :  { %v1603_v56 = vsel %vm1579_vm2, %v1602_v23, 0.0 }
 0x23b   :  { %v1604_v24 = vrot.slane %v1603_v56, 4 }
 0x23d   :  { %v1605_v18 = vadd.f32 %v1604_v24, %v1603_v56 }
 0x23f   :  { %v1606_v26 = vrot.slane %v1605_v18, 2 }
 0x241   :  { %v1607_v15 = vadd.f32 %v1606_v26, %v1605_v18 }
 0x243   :  { %v1608_v35 = vrot.slane %v1607_v15, 1 }
 0x245   :  { %v1609_v20 = vadd.f32 %v1608_v35, %v1607_v15 }
 0x247   :  { %v1610_v45 = vadd.f32 %v1609_v20, %v1589_v33 }
 0x249   :  { %1612 = vrot.lane.b32.xlu1 %v1610_v45, %s1678_s17 }
 0x297   :  { %v1594_v17 = vpop.permute.xlu0 %1593 }
 0x298   :  { %1597 = vst.msk [vmem:[#allocation3] sm:$0x1] %vm1596_vm8, %v1594_v17 }
 0x2bb   :  { %v1613_v48 = vpop.permute.xlu1 %1612 }
 0x2bc   :  { %1615 = vst.msk [vmem:[#allocation3 + $0x1] sm:$0x1] %vm1596_vm8, %v1613_v48 }
 0x2bd   :  { %1656 = shalt.err (!%p1653_p4)
}
 0x2be   :  { %1625 = dma.vmem_to_hbm [thread:$0]  %s1623_s22, 32, %s2437_s2, [#allocation4]  }
 0x2bf   :  { %1665 = dma.done.wait [#allocation4], 32  }
 0x2c0   :  { %1666 = vsyncadd [#allocation4], 4294967264 }
 0x2c1   :  { %1629 = vsyncpa [#allocation4], 1 }

</bundles_post_ra>
